<compile_context>
chip_gen: v5e
topology: v5e:2x2
jax: 0.10.0
libtpu: 0.0.40
codegen_flags: <defaults>
</compile_context>

<pallas_src>
import functools
import math

import jax
import jax.numpy as jnp
from jax import lax
from jax.experimental import pallas as pl
from jax.experimental.pallas import tpu as pltpu


# ---------------------------------------------------------------------------
# Stage 1: cosine similarity (one-shot; feat/proto buffers die after this call)
# ---------------------------------------------------------------------------
def _cosine_sim_kernel(feat_ref, proto_ref, att_ref):
    feat = feat_ref[...].astype(jnp.float32)      # [bb, num, c]
    proto = proto_ref[...].astype(jnp.float32)    # [bb, k, c]
    # F.normalize(p=2, eps=1e-12): x / max(||x||, 1e-12) == x * rsqrt(max(||x||^2, 1e-24))
    feat_n = feat * lax.rsqrt(
        jnp.maximum(jnp.sum(feat * feat, axis=-1, keepdims=True), 1e-24))
    proto_n = proto * lax.rsqrt(
        jnp.maximum(jnp.sum(proto * proto, axis=-1, keepdims=True), 1e-24))
    # att_t [bb, k, num]: num rides the lane axis for the Sinkhorn stage.
    att_ref[...] = jnp.einsum('bkc,bnc->bkn', proto_n, feat_n,
                              preferred_element_type=jnp.float32).astype(att_ref.dtype)


# ---------------------------------------------------------------------------
# Stage 2: Sinkhorn iterations on att_t + mask (transposed layout: num on lanes)
# ---------------------------------------------------------------------------
def _sinkhorn_kernel(att_ref, mask_ref, out_ref, *, num, k, reg, num_iter, unroll):
    att_t = att_ref[...].astype(jnp.float32)      # [bb, k, num]
    mask = mask_ref[...].astype(jnp.float32)      # [bb, 1, num]
    bb = att_t.shape[0]

    # --- marginals (per batch element) ---
    inv_num = 1.0 / float(num)
    num_bg = jnp.sum((mask == 0.0).astype(jnp.float32),
                     axis=-1, keepdims=True)                     # [bb, 1, 1]
    num_fg = float(num) - num_bg
    b_main = (num_fg / float(k)) * inv_num    # marginal of each of the k real columns
    b_trash = num_bg * inv_num                # marginal of the trash column
    a_marg = inv_num                          # uniform source marginal (scalar)

    # --- Gibbs kernel; trash column kept separate (no concat / slice) ---
    inv_reg = 1.0 / float(reg)
    K_main = jnp.exp((att_t - 1.0) * inv_reg)                    # exp(-(1-att)/reg)
    # trash cost is 2 where mask>0 else 0 -> Gibbs entry is a constant select
    K_trash = jnp.where(mask > 0.0, float(math.exp(-2.0 * inv_reg)), 1.0)  # [bb,1,num]

    tiny = 1e-35

    def step(u, v_main, v_trash, exact):
        # K^T u (reduce over num, the lane axis)
        ktu_main = jnp.sum(K_main * u, axis=-1, keepdims=True)   # [bb, k, 1]
        ktu_trash = jnp.sum(K_trash * u, axis=-1, keepdims=True)  # [bb, 1, 1]
        if exact:
            v_main = b_main / jnp.maximum(ktu_main, tiny)
            v_trash = b_trash / jnp.maximum(ktu_trash, tiny)
        else:
            v_main = b_main * pl.reciprocal(jnp.maximum(ktu_main, tiny), approx=True)
            v_trash = b_trash * pl.reciprocal(jnp.maximum(ktu_trash, tiny), approx=True)
        # K v (reduce over k, the sublane axis, + trash contribution)
        kv = (jnp.sum(K_main * v_main, axis=1, keepdims=True)
              + K_trash * v_trash)                               # [bb, 1, num]
        if exact:
            u = a_marg / jnp.maximum(kv, tiny)
        else:
            u = a_marg * pl.reciprocal(jnp.maximum(kv, tiny), approx=True)
        return u, v_main, v_trash

    def body(_, carry):
        return step(*carry, exact=False)

    u0 = jnp.full((bb, 1, num), inv_num, dtype=jnp.float32)
    v0_main = jnp.full((bb, k, 1), 1.0 / (k + 1), dtype=jnp.float32)
    v0_trash = jnp.full((bb, 1, 1), 1.0 / (k + 1), dtype=jnp.float32)

    # TODO(synk): stopThr=0.1 early-exit of the original Sinkhorn is dropped;
    # a fixed number of iterations is run (data-dependent early exit not expressed).
    u, v_main, v_trash = lax.fori_loop(0, max(num_iter - 1, 0), body,
                                       (u0, v0_main, v0_trash), unroll=unroll)
    if num_iter > 0:
        # Final iteration with exact divides so the chained approximate
        # reciprocals do not land in the transport plan.
        u, v_main, v_trash = step(u, v_main, v_trash, exact=True)

    # transport plan (trash column dropped) * num, ReLU; stored transposed [bb,k,num]
    t_main = u * K_main * v_main * float(num)
    out_ref[...] = jnp.maximum(t_main, 0.0).astype(out_ref.dtype)


# ---------------------------------------------------------------------------
# Wrapper helpers
# ---------------------------------------------------------------------------
def _pick_batch_block(b, per_batch_bytes, budget_bytes, requested=None):
    """Largest divisor of b whose block fits the VMEM budget; prefers a 2-way
    split of the batch (v7x megacore) when the whole batch would otherwise fit."""
    if requested is not None and requested > 0 and b % requested == 0:
        return requested
    fit = max(1, int(budget_bytes) // max(int(per_batch_bytes), 1))
    divisors = [d for d in range(1, b + 1) if b % d == 0]
    candidates = [d for d in divisors if d <= fit]
    bb = max(candidates) if candidates else 1
    # v7x megacore: if the whole batch fits in a single block, split it across
    # the two TensorCores as long as each half stays sublane-friendly (>= 8).
    if bb == b and b % 2 == 0 and (b // 2) >= 8:
        bb = b // 2
    return bb


def _vmem_limit_bytes(block_bytes):
    # Explicit scoped-VMEM limit with headroom; floor at the generous default
    # (32 MiB) and cap well below v7x's 64 MiB physical per-TC VMEM.
    return int(min(48 << 20, max(32 << 20, (int(block_bytes) * 3) // 2)))


def ot_enhance_similarity(feat, prototypes, masks, *, reg=0.05, num_iter=100,
                          batch_block=None, unroll=8,
                          vmem_budget_bytes=24 << 20, transposed_output=False):
    """feat [b,num,c], prototypes [b,k,c], masks [b,num] -> sim [b,num,k]
    (or [b,k,num] when transposed_output=True, skipping the HBM transpose)."""
    b, num, c = feat.shape
    _, k, _ = prototypes.shape
    f32 = 4

    # -------- stage 1: cosine similarity -> att_t [b, k, num] --------
    cos_per_batch = f32 * (2 * (num * c + k * c + k * num)        # double-buffered I/O
                           + 2 * (num * c + k * c + k * num))     # normalisation temps
    bb_c = _pick_batch_block(b, cos_per_batch, vmem_budget_bytes, batch_block)
    att_t = pl.pallas_call(
        _cosine_sim_kernel,
        out_shape=jax.ShapeDtypeStruct((b, k, num), jnp.float32),
        grid_spec=pltpu.PrefetchScalarGridSpec(
            num_scalar_prefetch=0,
            grid=(b // bb_c,),
            in_specs=[
                pl.BlockSpec((bb_c, num, c), lambda i: (i, 0, 0)),
                pl.BlockSpec((bb_c, k, c), lambda i: (i, 0, 0)),
            ],
            out_specs=pl.BlockSpec((bb_c, k, num), lambda i: (i, 0, 0)),
        ),
        compiler_params=pltpu.CompilerParams(
            dimension_semantics=("parallel",),
            vmem_limit_bytes=_vmem_limit_bytes(bb_c * cos_per_batch)),
    )(feat, prototypes)

    # -------- stage 2: Sinkhorn on att_t + masks --------
    # Note: with num <= 64 every in-loop vreg is half lane-occupied; packing two
    # batch elements per lane row would double VPU/XLU utilisation at large batch
    # (skipped here — only worthwhile once the loop is throughput-bound).
    sink_per_batch = f32 * (2 * (k * num + num + k * num)         # double-buffered I/O
                            + 5 * k * num + 4 * num)              # K_main, T, temps, u
    bb_s = _pick_batch_block(b, sink_per_batch, vmem_budget_bytes, batch_block)
    nblk = b // bb_s
    masks3 = masks.reshape(b, 1, num)   # num on lanes inside the kernel

    kernel = functools.partial(_sinkhorn_kernel, num=num, k=k, reg=float(reg),
                               num_iter=num_iter, unroll=unroll)
    out_t = pl.pallas_call(
        kernel,
        out_shape=jax.ShapeDtypeStruct((b, k, num), jnp.float32),
        grid_spec=pltpu.PrefetchScalarGridSpec(
            num_scalar_prefetch=0,
            grid=(nblk,),
            in_specs=[
                pl.BlockSpec((bb_s, k, num), lambda i: (i, 0, 0)),
                pl.BlockSpec((bb_s, 1, num), lambda i: (i, 0, 0)),
            ],
            out_specs=pl.BlockSpec((bb_s, k, num), lambda i: (i, 0, 0)),
        ),
        compiler_params=pltpu.CompilerParams(
            dimension_semantics=("parallel",),
            vmem_limit_bytes=_vmem_limit_bytes(bb_s * sink_per_batch)),
    )(att_t, masks3)

    if transposed_output:
        return out_t                           # [b, k, num] — avoids the HBM transpose
    return jnp.transpose(out_t, (0, 2, 1))     # [b, num, k]


# ---------------------------------------------------------------------------
# Pure-JAX reference mirroring the PyTorch forward (fixed-iteration Sinkhorn)
# ---------------------------------------------------------------------------
def _reference(feat, prototypes, masks, *, reg=0.05, num_iter=100):
    b, num, c = feat.shape
    _, k, _ = prototypes.shape
    fn = feat / jnp.maximum(jnp.linalg.norm(feat, axis=-1, keepdims=True), 1e-12)
    pn = prototypes / jnp.maximum(jnp.linalg.norm(prototypes, axis=-1, keepdims=True), 1e-12)
    att = jnp.einsum('bnc,bkc->bnk', fn, pn)
    num_bg = jnp.sum((masks == 0).astype(jnp.float32), axis=-1, keepdims=True)  # [b,1]
    num_fg = num - num_bg
    trash = jnp.where(masks > 0, 2.0, 0.0)[..., None]
    cost = jnp.concatenate([1.0 - att, trash], axis=-1)
    K = jnp.exp(-cost / reg)
    a = jnp.full((b, num, 1), 1.0 / num)
    b_marg = jnp.concatenate([jnp.repeat(num_fg / k, k, axis=-1), num_bg], axis=-1) / num
    b_marg = b_marg[:, None, :]                                                   # [b,1,k+1]
    u = jnp.full((b, num, 1), 1.0 / num)
    v = jnp.full((b, 1, k + 1), 1.0 / (k + 1))
    for _ in range(num_iter):
        v = b_marg / jnp.sum(K * u, axis=1, keepdims=True)
        u = a / jnp.sum(K * v, axis=2, keepdims=True)
    T = u * K * v * num
    return jnp.maximum(T[:, :, :k], 0.0)


if __name__ == "__main__":
    key = jax.random.PRNGKey(0)
    k1, k2, k3 = jax.random.split(key, 3)

    B, NUM, C, K = 2, 64, 32, 8
    feat = jax.random.normal(k1, (B, NUM, C), dtype=jnp.float32)
    prototypes = jax.random.normal(k2, (B, K, C), dtype=jnp.float32)
    masks = (jax.random.uniform(k3, (B, NUM)) > 0.4).astype(jnp.float32)

    out = ot_enhance_similarity(feat, prototypes, masks)
    out = jax.block_until_ready(out)

    ref = jax.block_until_ready(_reference(feat, prototypes, masks))
    assert out.shape == (B, NUM, K)
    assert bool(jnp.all(jnp.isfinite(out)))
    assert bool(jnp.allclose(out, ref, rtol=5e-2, atol=1e-3)), "mismatch vs reference"
    print("KERNEL_OK")
</pallas_src>

<mosaic_0001>
module attributes {stable_mosaic.version = 11 : i64} {
  func.func @_cosine_sim_kernel(%arg0: i32, %arg1: memref<2x64x32xf32, #tpu.memory_space<vmem>>, %arg2: memref<2x8x32xf32, #tpu.memory_space<vmem>>, %arg3: memref<2x8x64xf32, #tpu.memory_space<vmem>>) attributes {dimension_semantics = [#tpu.dimension_semantics<parallel>], iteration_bounds = array<i64: 1>, scalar_prefetch = 0 : i64, scratch_operands = 0 : i64, tpu.core_type = #tpu.core_type<tc>, window_params = [{transform_indices = @transform_0, window_bounds = array<i64: 2, 64, 32>}, {transform_indices = @transform_1, window_bounds = array<i64: 2, 8, 32>}, {transform_indices = @transform_2, window_bounds = array<i64: 2, 8, 64>}]} {
    %c0 = arith.constant 0 : index
    %c0_0 = arith.constant 0 : index
    %c0_1 = arith.constant 0 : index
    %0 = vector.load %arg1[%c0, %c0_0, %c0_1] : memref<2x64x32xf32, #tpu.memory_space<vmem>>, vector<2x64x32xf32>
    %c0_2 = arith.constant 0 : index
    %c0_3 = arith.constant 0 : index
    %c0_4 = arith.constant 0 : index
    %1 = vector.load %arg2[%c0_2, %c0_3, %c0_4] : memref<2x8x32xf32, #tpu.memory_space<vmem>>, vector<2x8x32xf32>
    %2 = arith.mulf %0, %0 : vector<2x64x32xf32>
    %cst = arith.constant dense<0.000000e+00> : vector<2x64xf32>
    %3 = vector.multi_reduction <add>, %2, %cst [2] : vector<2x64x32xf32> to vector<2x64xf32>
    %4 = vector.shape_cast %3 : vector<2x64xf32> to vector<2x64x1xf32>
    %cst_5 = arith.constant 1.000000e-24 : f32
    %5 = vector.broadcast %cst_5 : f32 to vector<2x64x1xf32>
    %6 = arith.maximumf %4, %5 : vector<2x64x1xf32>
    %7 = math.rsqrt %6 : vector<2x64x1xf32>
    %8 = vector.broadcast %7 : vector<2x64x1xf32> to vector<2x64x32xf32>
    %9 = arith.mulf %0, %8 : vector<2x64x32xf32>
    %10 = arith.mulf %1, %1 : vector<2x8x32xf32>
    %cst_6 = arith.constant dense<0.000000e+00> : vector<2x8xf32>
    %11 = vector.multi_reduction <add>, %10, %cst_6 [2] : vector<2x8x32xf32> to vector<2x8xf32>
    %12 = vector.shape_cast %11 : vector<2x8xf32> to vector<2x8x1xf32>
    %cst_7 = arith.constant 1.000000e-24 : f32
    %13 = vector.broadcast %cst_7 : f32 to vector<2x8x1xf32>
    %14 = arith.maximumf %12, %13 : vector<2x8x1xf32>
    %15 = math.rsqrt %14 : vector<2x8x1xf32>
    %16 = vector.broadcast %15 : vector<2x8x1xf32> to vector<2x8x32xf32>
    %17 = arith.mulf %1, %16 : vector<2x8x32xf32>
    "tpu.trace_start"() <{level = 10 : i32, message = "bkc,bnc->bkn"}> : () -> ()
    %cst_8 = arith.constant dense<0.000000e+00> : vector<2x8x64xf32>
    %18 = tpu.matmul %17, %9, %cst_8 {dimension_numbers = #tpu.dot_dimension_numbers<[2], [2], [1], [1], [0, 0, 0, 1, 1, 1], [0], [0]>} : vector<2x8x32xf32>, vector<2x64x32xf32>, vector<2x8x64xf32> -> vector<2x8x64xf32>
    "tpu.trace_stop"() : () -> ()
    %c0_9 = arith.constant 0 : index
    %c0_10 = arith.constant 0 : index
    %c0_11 = arith.constant 0 : index
    %19 = vector.load %arg3[%c0_9, %c0_10, %c0_11] : memref<2x8x64xf32, #tpu.memory_space<vmem>>, vector<2x8x64xf32>
    tpu.vector_store %arg3[%c0_9, %c0_10, %c0_11], %18 {strides = array<i32>} : memref<2x8x64xf32, #tpu.memory_space<vmem>>, vector<2x8x64xf32>,
    return
  }
  func.func @transform_0(%arg0: i32) -> (i32, i32, i32) {
    %c0_i32 = arith.constant 0 : i32
    %c0_i32_0 = arith.constant 0 : i32
    %c0_i32_1 = arith.constant 0 : i32
    return %arg0, %c0_i32, %c0_i32_0 : i32, i32, i32
  }
  func.func @transform_1(%arg0: i32) -> (i32, i32, i32) {
    %c0_i32 = arith.constant 0 : i32
    %c0_i32_0 = arith.constant 0 : i32
    %c0_i32_1 = arith.constant 0 : i32
    return %arg0, %c0_i32, %c0_i32_0 : i32, i32, i32
  }
  func.func @transform_2(%arg0: i32) -> (i32, i32, i32) {
    %c0_i32 = arith.constant 0 : i32
    %c0_i32_0 = arith.constant 0 : i32
    %c0_i32_1 = arith.constant 0 : i32
    return %arg0, %c0_i32, %c0_i32_0 : i32, i32, i32
  }
}

</mosaic_0001>

<bundles_post_ra>
// kernel: tpu_custom_call.1
= control target key start
LH: loop header
LB: loop body
LE: loop exit
PB: predicated region body
PF: predicated region fallthrough
CT: control target
= control target key end

     0   :  { %vm46_vm0 = vcmask 261120   ;;  %s991_s0 = inlined_call_operand.vmem [shape: f32[2,64,32], index: 0, kind: input, shape index: {}]   ;;  %s992_s1 = inlined_call_operand.vmem [shape: f32[2,8,32], index: 1, kind: input, shape index: {}]   ;;  %s993_s2 = inlined_call_operand.hbm [shape: f32[2,8,64], index: 2, kind: output, shape index: {}]  }
   0x1   :  { %v538_v0 = vld [vmem:[%s991_s0 + $0x38] sm:$0xff]  ;;  %v543_v1 = vld [vmem:[%s991_s0 + $0x30] sm:$0xff]  ;;  %v548_v2 = vld [vmem:[%s991_s0 + $0x28] sm:$0xff] }
   0x2   :  { %v37_v3 = vmul.f32 %v538_v0, %v538_v0  ;;  %v36_v4 = vmul.f32 %v543_v1, %v543_v1  ;;  %v35_v5 = vmul.f32 %v548_v2, %v548_v2  ;;  %v559_v6 = vld [vmem:[%s991_s0 + $0x78] sm:$0xff]  ;;  %v564_v7 = vld [vmem:[%s991_s0 + $0x70] sm:$0xff]  ;;  %v572_v11 = vld [vmem:[%s991_s0 + $0x68] sm:$0xff] }
   0x3   :  { %v45_v12 = vmul.f32 %v559_v6, %v559_v6  ;;  %v44_v13 = vmul.f32 %v564_v7, %v564_v7 }
   0x4   :  { %v68_v8 = vsel %vm46_vm0, %v37_v3, 0.0  ;;  %v65_v9 = vsel %vm46_vm0, %v36_v4, 0.0  ;;  %v62_v10 = vsel %vm46_vm0, %v35_v5, 0.0 }
   0x5   :  { %69 = vadd.xlane.f32.xlu0 %v68_v8  ;;  %66 = vadd.xlane.f32.xlu1 %v65_v9 }
   0x6   :  { %63 = vadd.xlane.f32.xlu2 %v62_v10 }
   0x7   :  { %7 = vsyncpa [#allocation3], 0  ;;  %v43_v14 = vmul.f32 %v572_v11, %v572_v11  ;;  %v92_v15 = vsel %vm46_vm0, %v45_v12, 0.0  ;;  %v89_v16 = vsel %vm46_vm0, %v44_v13, 0.0  ;;  %v586_v18 = vld [vmem:[%s991_s0 + $0x60] sm:$0xff]  ;;  %v596_v20 = vld [vmem:[%s991_s0 + $0x18] sm:$0xff] }
   0x8   :  { %v591_v19 = vld [vmem:[%s991_s0 + $0x20] sm:$0xff]  ;;  %v42_v21 = vmul.f32 %v586_v18, %v586_v18  ;;  %v33_v23 = vmul.f32 %v596_v20, %v596_v20  ;;  %v610_v27 = vld [vmem:[%s991_s0 + $0x58] sm:$0xff]  ;;  %v615_v28 = vld [vmem:[%s991_s0 + $0x10] sm:$0xff]  ;;  %s422_s19 = sshll.u32 %s993_s2, 4  ;;  %s518_s20 = smov 128   ;;  %s423_s19 = int_to_ptr.hbm [resolvable:$true] %s422_s19 }
   0x9   :  { %v86_v17 = vsel %vm46_vm0, %v43_v14, 0.0  ;;  %v34_v22 = vmul.f32 %v591_v19, %v591_v19  ;;  %v620_v29 = vld [vmem:[%s991_s0 + $0x50] sm:$0xff]  ;;  %v41_v30 = vmul.f32 %v610_v27, %v610_v27  ;;  %v32_v31 = vmul.f32 %v615_v28, %v615_v28  ;;  %v634_v36 = vld [vmem:[%s991_s0 + $0x48] sm:$0xff]  ;;  %v644_v38 = vld [vmem:[%s991_s0] sm:$0xff]  ;;  %s519_s21 = smov 8  }
   0xa   :  { %v83_v24 = vsel %vm46_vm0, %v42_v21, 0.0  ;;  %v56_v26 = vsel %vm46_vm0, %v33_v23, 0.0  ;;  %v40_v32 = vmul.f32 %v620_v29, %v620_v29  ;;  %v639_v37 = vld [vmem:[%s991_s0 + $0x8] sm:$0xff]  ;;  %v39_v39 = vmul.f32 %v634_v36, %v634_v36  ;;  %v658_v45 = vld [vmem:[%s992_s1] sm:$0xff] }
   0xb   :  { %v59_v25 = vsel %vm46_vm0, %v34_v22, 0.0  ;;  %v80_v33 = vsel %vm46_vm0, %v41_v30, 0.0  ;;  %v53_v34 = vsel %vm46_vm0, %v32_v31, 0.0  ;;  %v31_v40 = vmul.f32 %v639_v37, %v639_v37  ;;  %v663_v46 = vld [vmem:[%s991_s0 + $0x40] sm:$0xff]  ;;  %v668_v47 = vld [vmem:[%s992_s1 + $0x8] sm:$0xff]  ;;  %s517_s0 = smov [#allocation2]  }
   0xc   :  { %v77_v35 = vsel %vm46_vm0, %v40_v32, 0.0  ;;  %v30_v41 = vmul.f32 %v644_v38, %v644_v38  ;;  %v74_v42 = vsel %vm46_vm0, %v39_v39, 0.0  ;;  %v287_v48 = vmul.f32 %v658_v45, %v658_v45  ;;  %s420_s1 = sshll.u32 %s517_s0, 4  ;;  %s421_s1 = int_to_ptr.vmem [resolvable:$true] %s420_s1 }
   0xd   :  { %93 = vadd.xlane.f32.xlu0 %v92_v15  ;;  %90 = vadd.xlane.f32.xlu1 %v89_v16  ;;  %v50_v43 = vsel %vm46_vm0, %v31_v40, 0.0  ;;  %v38_v49 = vmul.f32 %v663_v46, %v663_v46  ;;  %v288_v50 = vmul.f32 %v668_v47, %v668_v47 }
   0xe   :  { %87 = vadd.xlane.f32.xlu2 %v86_v17  ;;  %v47_v44 = vsel %vm46_vm0, %v30_v41, 0.0  ;;  %v289_v51 = vsel %vm46_vm0, %v287_v48, 0.0 }
   0xf   :  { %v71_v52 = vsel %vm46_vm0, %v38_v49, 0.0  ;;  %v292_v53 = vsel %vm46_vm0, %v288_v50, 0.0 }
  0x15   :  { %84 = vadd.xlane.f32.xlu1 %v83_v24  ;;  %60 = vadd.xlane.f32.xlu0 %v59_v25 }
  0x16   :  { %57 = vadd.xlane.f32.xlu2 %v56_v26 }
  0x1d   :  { %81 = vadd.xlane.f32.xlu0 %v80_v33  ;;  %54 = vadd.xlane.f32.xlu1 %v53_v34 }
  0x1e   :  { %78 = vadd.xlane.f32.xlu2 %v77_v35 }
  0x25   :  { %75 = vadd.xlane.f32.xlu1 %v74_v42  ;;  %51 = vadd.xlane.f32.xlu0 %v50_v43 }
  0x26   :  { %48 = vadd.xlane.f32.xlu2 %v47_v44 }
  0x2d   :  { %290 = vadd.xlane.f32.xlu1 %v289_v51  ;;  %72 = vadd.xlane.f32.xlu0 %v71_v52 }
  0x2e   :  { %293 = vadd.xlane.f32.xlu2 %v292_v53 }
  0x78   :  { %v70_v54 = vpop.xlane.xlu0 %69  ;;  %v67_v55 = vpop.xlane.xlu1 %66 }
  0x79   :  { %v102_v56 = vmax.f32 %v70_v54, 1e-24  ;;  %v101_v57 = vmax.f32 %v67_v55, 1e-24  ;;  %v64_v58 = vpop.xlane.xlu2 %63 }
  0x7a   :  { %v679_v59 = vmax.f32 %v64_v58, 1e-24 }
  0x7b   :  { %455 = vrsqrt.f32 %v102_v56  ;;  %vm187_vm2 = vweird.f32 %v102_v56  ;;  %vm177_vm4 = vweird.f32 %v101_v57 }
  0x7c   :  { %457 = vrsqrt.f32 %v101_v57  ;;  %vm167_vm7 = vweird.f32 %v679_v59 }
  0x7d   :  { %459 = vrsqrt.f32 %v679_v59 }
  0x80   :  { %v94_v60 = vpop.xlane.xlu0 %93  ;;  %v91_v61 = vpop.xlane.xlu1 %90 }
  0x81   :  { %v456_v62 = vpop.eup %455  ;;  %v682_v63 = vmax.f32 %v94_v60, 1e-24  ;;  %v684_v3 = vmax.f32 %v91_v61, 1e-24  ;;  %v88_v4 = vpop.xlane.xlu2 %87 }
  0x82   :  { %v686_v5 = vpop.eup %457  ;;  %v182_v8 = vmul.f32 %v456_v62, %v102_v56  ;;  %v688_v9 = vmax.f32 %v88_v4, 1e-24  ;;  %vm188_vm1 = vweird.f32 %v456_v62 }
  0x83   :  { %v690_v10 = vpop.eup %459  ;;  %v172_v12 = vmul.f32 %v686_v5, %v101_v57  ;;  %461 = vrsqrt.f32 %v682_v63  ;;  %vm178_vm3 = vweird.f32 %v686_v5  ;;  %vm189_vm5 = vmor %vm187_vm2, %vm188_vm1  ;;  %vm267_vm9 = vweird.f32 %v682_v63 }
  0x84   :  { %v183_v13 = vmul.f32 %v456_v62, %v182_v8  ;;  %v162_v14 = vmul.f32 %v690_v10, %v679_v59  ;;  %463 = vrsqrt.f32 %v684_v3  ;;  %vm726_vm6 = vmor %vm177_vm4, %vm178_vm3  ;;  %vm168_vm8 = vweird.f32 %v690_v10 }
  0x85   :  { %v173_v15 = vmul.f32 %v686_v5, %v172_v12  ;;  %465 = vrsqrt.f32 %v688_v9  ;;  %vm169_vm11 = vmor %vm167_vm7, %vm168_vm8  ;;  %vm257_vm12 = vweird.f32 %v684_v3  ;;  %vm247_vm13 = vweird.f32 %v688_v9 }
  0x86   :  { %v184_v16 = vmul.f32 0.5, %v183_v13  ;;  %v163_v17 = vmul.f32 %v690_v10, %v162_v14 }
  0x87   :  { %v174_v21 = vmul.f32 0.5, %v173_v15 }
  0x88   :  { %v185_v22 = vsub.f32 1.5, %v184_v16  ;;  %v85_v23 = vpop.xlane.xlu1 %84  ;;  %v61_v24 = vpop.xlane.xlu0 %60  ;;  %v164_v26 = vmul.f32 0.5, %v163_v17 }
  0x89   :  { %v700_v25 = vpop.eup %461  ;;  %v702_v30 = vmax.f32 %v85_v23, 1e-24  ;;  %v704_v31 = vmax.f32 %v61_v24, 1e-24  ;;  %v58_v32 = vpop.xlane.xlu2 %57  ;;  %v175_v34 = vsub.f32 1.5, %v174_v21 }
  0x8a   :  { %v706_v33 = vpop.eup %463  ;;  %v262_v35 = vmul.f32 %v700_v25, %v682_v63  ;;  %v710_v39 = vmax.f32 %v58_v32, 1e-24  ;;  %v186_v40 = vmul.f32 %v456_v62, %v185_v22  ;;  %v165_v48 = vsub.f32 1.5, %v164_v26 }
  0x8b   :  { %v712_v41 = vpop.eup %465  ;;  %v252_v42 = vmul.f32 %v706_v33, %v684_v3  ;;  %467 = vrsqrt.f32 %v702_v30  ;;  %v176_v52 = vmul.f32 %v686_v5, %v175_v34  ;;  %vm268_vm10 = vweird.f32 %v700_v25 }
  0x8c   :  { %v263_v43 = vmul.f32 %v700_v25, %v262_v35  ;;  %v242_v44 = vmul.f32 %v712_v41, %v688_v9  ;;  %469 = vrsqrt.f32 %v704_v31  ;;  %v190_v51 = vsel %vm189_vm5, %v456_v62, %v186_v40  ;;  %vm269_vm15 = vmor %vm267_vm9, %vm268_vm10 }
  0x8d   :  { %471 = vrsqrt.f32 %v710_v39  ;;  %v253_v50 = vmul.f32 %v706_v33, %v252_v42  ;;  %v278_v54 = vmul.f32 %v190_v51, %v538_v0  ;;  %v180_v58 = vsel %vm726_vm6, %v686_v5, %v176_v52 }
  0x8e   :  { %v264_v49 = vmul.f32 0.5, %v263_v43  ;;  %v243_v55 = vmul.f32 %v712_v41, %v242_v44  ;;  %v166_v5 = vmul.f32 %v690_v10, %v165_v48  ;;  %v277_v17 = vmul.f32 %v180_v58, %v543_v1 }
  0x8f   :  { %434 = vmatpush.xpose.msk.msra.mxu0 %vm46_vm0, %v278_v54  ;;  %v254_v12 = vmul.f32 0.5, %v253_v50  ;;  %vm258_vm14 = vweird.f32 %v706_v33  ;;  %vm248_vm1 = vweird.f32 %v712_v41  ;;  %vm157_vm2 = vweird.f32 %v704_v31 }
  0x90   :  { %v82_v56 = vpop.xlane.xlu0 %81  ;;  %v55_v57 = vpop.xlane.xlu1 %54  ;;  %v265_v8 = vsub.f32 1.5, %v264_v49  ;;  %v244_v21 = vmul.f32 0.5, %v243_v55  ;;  %v170_v26 = vsel %vm169_vm11, %v690_v10, %v166_v5  ;;  %vm147_vm4 = vweird.f32 %v710_v39  ;;  %vm259_vm5 = vmor %vm257_vm12, %vm258_vm14 }
  0x91   :  { %v736_v60 = vpop.eup %467  ;;  %v741_v61 = vmax.f32 %v82_v56, 1e-24  ;;  %v79_v0 = vpop.xlane.xlu2 %78  ;;  %v743_v62 = vmax.f32 %v55_v57, 1e-24  ;;  %v255_v1 = vsub.f32 1.5, %v254_v12  ;;  %v276_v35 = vmul.f32 %v170_v26, %v548_v2  ;;  %vm826_vm8 = vmor %vm247_vm13, %vm248_vm1 }
  0x92   :  { %v745_v4 = vpop.eup %469  ;;  %v747_v13 = vmax.f32 %v79_v0, 1e-24  ;;  %v232_v15 = vmul.f32 %v736_v60, %v702_v30  ;;  %v266_v32 = vmul.f32 %v700_v25, %v265_v8  ;;  %v245_v40 = vsub.f32 1.5, %v244_v21 }
  0x93   :  { %v750_v14 = vpop.eup %471  ;;  %v152_v16 = vmul.f32 %v745_v4, %v704_v31  ;;  %473 = vrsqrt.f32 %v741_v61  ;;  %435 = vmatpush.xpose.msk.msra.mxu0 %vm46_vm0, %v277_v17  ;;  %v256_v54 = vmul.f32 %v706_v33, %v255_v1  ;;  %vm158_vm3 = vweird.f32 %v745_v4 }
  0x94   :  { %v142_v22 = vmul.f32 %v750_v14, %v710_v39  ;;  %475 = vrsqrt.f32 %v747_v13  ;;  %v233_v59 = vmul.f32 %v736_v60, %v232_v15  ;;  %v270_v10 = vsel %vm269_vm15, %v700_v25, %v266_v32  ;;  %vm159_vm9 = vmor %vm157_vm2, %vm158_vm3 }
  0x95   :  { %v153_v23 = vmul.f32 %v745_v4, %v152_v16  ;;  %477 = vrsqrt.f32 %v743_v62  ;;  %v286_v2 = vmul.f32 %v270_v10, %v559_v6  ;;  %v246_v0 = vmul.f32 %v712_v41, %v245_v40 }
  0x96   :  { %v143_v24 = vmul.f32 %v750_v14, %v142_v22  ;;  %v801_v56 = vmul.f32 0.5, %v233_v59  ;;  %vm237_vm6 = vweird.f32 %v702_v30  ;;  %vm238_vm7 = vweird.f32 %v736_v60 }
  0x97   :  { %v154_v34 = vmul.f32 0.5, %v153_v23  ;;  %436 = vmatpush.xpose.msk.msra.mxu0 %vm46_vm0, %v276_v35  ;;  %443 = vmatpush.xpose.msk.msra.mxu1 %vm46_vm0, %v286_v2  ;;  %v260_v16 = vsel %vm259_vm5, %v706_v33, %v256_v54  ;;  %vm148_vm10 = vweird.f32 %v750_v14  ;;  %vm227_vm11 = vweird.f32 %v741_v61  ;;  %vm886_vm2 = vmor %vm237_vm6, %vm238_vm7 }
  0x98   :  { %v76_v42 = vpop.xlane.xlu1 %75  ;;  %v52_v43 = vpop.xlane.xlu0 %51  ;;  %v144_v48 = vmul.f32 0.5, %v143_v24  ;;  %vm137_vm12 = vweird.f32 %v743_v62  ;;  %v285_v9 = vmul.f32 %v260_v16, %v564_v7  ;;  %v235_v21 = vsub.f32 1.5, %v801_v56  ;;  %vm149_vm15 = vmor %vm147_vm4, %vm148_vm10 }
  0x99   :  { %v784_v44 = vpop.eup %473  ;;  %v788_v49 = vmax.f32 %v76_v42, 1e-24  ;;  %v790_v63 = vmax.f32 %v52_v43, 1e-24  ;;  %v49_v50 = vpop.xlane.xlu2 %48  ;;  %v155_v52 = vsub.f32 1.5, %v154_v34  ;;  %v250_v23 = vsel %vm826_vm8, %v712_v41, %v246_v0 }
  0x9a   :  { %v792_v51 = vpop.eup %475  ;;  %v222_v25 = vmul.f32 %v784_v44, %v741_v61  ;;  %v796_v53 = vmax.f32 %v49_v50, 1e-24  ;;  %v145_v8 = vsub.f32 1.5, %v144_v48  ;;  %v284_v48 = vmul.f32 %v250_v23, %v572_v11 }
  0x9b   :  { %v799_v55 = vpop.eup %477  ;;  %v212_v6 = vmul.f32 %v792_v51, %v747_v13  ;;  %479 = vrsqrt.f32 %v788_v49  ;;  %v156_v17 = vmul.f32 %v745_v4, %v155_v52  ;;  %444 = vmatpush.xpose.msk.msra.mxu1 %vm46_vm0, %v285_v9  ;;  %vm228_vm13 = vweird.f32 %v784_v44 }
  0x9c   :  { %v223_v57 = vmul.f32 %v784_v44, %v222_v25  ;;  %v132_v58 = vmul.f32 %v799_v55, %v743_v62  ;;  %481 = vrsqrt.f32 %v790_v63  ;;  %v146_v10 = vmul.f32 %v750_v14, %v145_v8  ;;  %vm897_vm3 = vmor %vm227_vm11, %vm228_vm13 }
  0x9d   :  { %v213_v12 = vmul.f32 %v792_v51, %v212_v6  ;;  %483 = vrsqrt.f32 %v796_v53  ;;  %v160_v33 = vsel %vm159_vm9, %v745_v4, %v156_v17  ;;  %vm217_vm14 = vweird.f32 %v747_v13 }
  0x9e   :  { %v224_v15 = vmul.f32 0.5, %v223_v57  ;;  %v133_v3 = vmul.f32 %v799_v55, %v132_v58  ;;  %v275_v32 = vmul.f32 %v160_v33, %v591_v19  ;;  %vm138_vm1 = vweird.f32 %v799_v55 }
  0x9f   :  { %v214_v26 = vmul.f32 0.5, %v213_v12  ;;  %445 = vmatpush.xpose.msk.msra.mxu1 %vm46_vm0, %v284_v48  ;;  %v150_v56 = vsel %vm149_vm15, %v750_v14, %v146_v10  ;;  %v236_v6 = vmul.f32 %v736_v60, %v235_v21  ;;  %vm218_vm4 = vweird.f32 %v792_v51  ;;  %vm139_vm5 = vmor %vm137_vm12, %vm138_vm1 }
  0xa0   :  { %v134_v22 = vmul.f32 0.5, %v133_v3  ;;  %v291_v1 = vpop.xlane.xlu1 %290  ;;  %v73_v31 = vpop.xlane.xlu0 %72  ;;  %v225_v4 = vsub.f32 1.5, %v224_v15  ;;  %437 = vmatpush.xpose.msk.msra.mxu0 %vm46_vm0, %v275_v32  ;;  %v274_v58 = vmul.f32 %v150_v56, %v596_v20  ;;  %vm127_vm6 = vweird.f32 %v790_v63  ;;  %vm933_vm10 = vmor %vm217_vm14, %vm218_vm4 }
  0xa1   :  { %v846_v24 = vpop.eup %479  ;;  %v850_v59 = vmax.f32 %v291_v1, 1e-24  ;;  %v852_v7 = vmax.f32 %v73_v31, 1e-24  ;;  %v294_v34 = vpop.xlane.xlu2 %293  ;;  %v215_v52 = vsub.f32 1.5, %v214_v26  ;;  %v240_v12 = vsel %vm886_vm2, %v736_v60, %v236_v6 }
  0xa2   :  { %v854_v35 = vpop.eup %481  ;;  %v202_v41 = vmul.f32 %v846_v24, %v788_v49  ;;  %v858_v40 = vmax.f32 %v294_v34, 1e-24  ;;  %v135_v43 = vsub.f32 1.5, %v134_v22  ;;  %v226_v8 = vmul.f32 %v784_v44, %v225_v4 }
  0xa3   :  { %v861_v42 = vpop.eup %483  ;;  %v122_v19 = vmul.f32 %v854_v35, %v790_v63  ;;  %485 = vrsqrt.f32 %v850_v59  ;;  %v283_v20 = vmul.f32 %v240_v12, %v586_v18  ;;  %v216_v60 = vmul.f32 %v792_v51, %v215_v52 }
  0xa4   :  { %v203_v2 = vmul.f32 %v846_v24, %v202_v41  ;;  %v112_v50 = vmul.f32 %v861_v42, %v796_v53  ;;  %487 = vrsqrt.f32 %v852_v7  ;;  %v136_v0 = vmul.f32 %v799_v55, %v135_v43  ;;  %438 = vmatpush.xpose.msk.msra.mxu0 %vm46_vm0, %v274_v58 }
  0xa5   :  { %v123_v11 = vmul.f32 %v854_v35, %v122_v19  ;;  %489 = vrsqrt.f32 %v858_v40  ;;  %v230_v16 = vsel %vm897_vm3, %v784_v44, %v226_v8  ;;  %vm128_vm7 = vweird.f32 %v854_v35  ;;  %446 = vmatpush.xpose.msk.msra.mxu1 %vm46_vm0, %v283_v20 }
  0xa6   :  { %v204_v54 = vmul.f32 0.5, %v203_v2  ;;  %v113_v39 = vmul.f32 %v861_v42, %v112_v50  ;;  %v140_v3 = vsel %vm139_vm5, %v799_v55, %v136_v0  ;;  %v282_v55 = vmul.f32 %v230_v16, %v610_v27  ;;  %vm129_vm12 = vmor %vm127_vm6, %vm128_vm7 }
  0xa7   :  { %v124_v30 = vmul.f32 0.5, %v123_v11  ;;  %v273_v21 = vmul.f32 %v140_v3, %v615_v28  ;;  %vm208_vm8 = vweird.f32 %v846_v24  ;;  %vm118_vm9 = vweird.f32 %v861_v42 }
  0xa8   :  { %v205_v14 = vsub.f32 1.5, %v204_v54  ;;  %v114_v61 = vmul.f32 0.5, %v113_v39  ;;  %vm207_vm11 = vweird.f32 %v788_v49  ;;  %v220_v32 = vsel %vm933_vm10, %v792_v51, %v216_v60 }
  0xa9   :  { %v486_v5 = vpop.eup %485  ;;  %v125_v15 = vsub.f32 1.5, %v124_v30  ;;  %439 = vmatpush.xpose.msk.msra.mxu0 %vm46_vm0, %v273_v21  ;;  %vm951_vm13 = vmor %vm207_vm11, %vm208_vm8  ;;  %vm117_vm14 = vweird.f32 %v796_v53  ;;  %447 = vmatpush.xpose.msk.msra.mxu1 %vm46_vm0, %v282_v55  ;;  %v281_v19 = vmul.f32 %v220_v32, %v620_v29  ;;  %vm303_vm3 = vweird.f32 %v850_v59 }
  0xaa   :  { %v488_v62 = vpop.eup %487  ;;  %v115_v17 = vsub.f32 1.5, %v114_v61  ;;  %v298_v9 = vmul.f32 %v486_v5, %v850_v59  ;;  %v206_v1 = vmul.f32 %v846_v24, %v205_v14  ;;  %vm304_vm15 = vweird.f32 %v486_v5  ;;  %vm960_vm1 = vmor %vm117_vm14, %vm118_vm9 }
  0xab   :  { %v490_v22 = vpop.eup %489  ;;  %v192_v18 = vmul.f32 %v488_v62, %v852_v7  ;;  %v126_v27 = vmul.f32 %v854_v35, %v125_v15  ;;  %vm198_vm2 = vweird.f32 %v488_v62  ;;  %vm305_vm4 = vmor %vm303_vm3, %vm304_vm15  ;;  %vm197_vm5 = vweird.f32 %v852_v7 }
  0xac   :  { %v299_v44 = vmul.f32 %v486_v5, %v298_v9  ;;  %v308_v28 = vmul.f32 %v490_v22, %v858_v40  ;;  %v116_v31 = vmul.f32 %v861_v42, %v115_v17  ;;  %v210_v53 = vsel %vm951_vm13, %v846_v24, %v206_v1  ;;  %vm199_vm6 = vmor %vm197_vm5, %vm198_vm2 }
  0xad   :  { %v193_v23 = vmul.f32 %v488_v62, %v192_v18  ;;  %v130_v63 = vsel %vm129_vm12, %v854_v35, %v126_v27  ;;  %448 = vmatpush.xpose.msk.msra.mxu1 %vm46_vm0, %v281_v19  ;;  %v280_v24 = vmul.f32 %v210_v53, %v634_v36  ;;  %vm314_vm7 = vweird.f32 %v490_v22 }
  0xae   :  { %v300_v13 = vmul.f32 0.5, %v299_v44  ;;  %v309_v26 = vmul.f32 %v490_v22, %v308_v28  ;;  %v272_v10 = vmul.f32 %v130_v63, %v639_v37  ;;  %v120_v35 = vsel %vm960_vm1, %v861_v42, %v116_v31 }
  0xaf   :  { %v194_v49 = vmul.f32 0.5, %v193_v23  ;;  %v271_v29 = vmul.f32 %v120_v35, %v644_v38  ;;  %vm313_vm8 = vweird.f32 %v858_v40  ;;  %vm413_vm10 = vcmask 523264  }
  0xb0   :  { %v301_v51 = vsub.f32 1.5, %v300_v13  ;;  %v310_v41 = vmul.f32 0.5, %v309_v26  ;;  %440 = vmatpush.xpose.msk.msra.mxu0 %vm46_vm0, %v272_v10  ;;  %vm315_vm9 = vmor %vm313_vm8, %vm314_vm7 }
  0xb1   :  { %v195_v43 = vsub.f32 1.5, %v194_v49  ;;  %449 = vmatpush.xpose.msk.msra.mxu1 %vm46_vm0, %v280_v24 }
  0xb2   :  { %v302_v48 = vmul.f32 %v486_v5, %v301_v51  ;;  %v311_v2 = vsub.f32 1.5, %v310_v41 }
  0xb3   :  { %v196_v37 = vmul.f32 %v488_v62, %v195_v43 }
  0xb4   :  { %v306_v50 = vsel %vm305_vm4, %v486_v5, %v302_v48  ;;  %v312_v42 = vmul.f32 %v490_v22, %v311_v2  ;;  %441 = vmatpush.xpose.msk.msra.mxu0 %vm46_vm0, %v271_v29 }
  0xb5   :  { %v317_v59 = vmul.f32 %v306_v50, %v658_v45  ;;  %v200_v52 = vsel %vm199_vm6, %v488_v62, %v196_v37 }
  0xb6   :  { %v279_v7 = vmul.f32 %v200_v52, %v663_v46  ;;  %v316_v36 = vsel %vm315_vm9, %v490_v22, %v312_v42 }
  0xb7   :  { %442 = vmatmul.msk.f32.vlgmr.msra.gmra.mxu0 %vm46_vm0, %v317_v59  ;;  %v318_v38 = vmul.f32 %v316_v36, %v668_v47 }
  0xb8   :  { %450 = vmatpush.xpose.msk.msra.mxu1 %vm46_vm0, %v279_v7 }
  0xbb   :  { %451 = vmatmul.msk.f32.vlgmr.msra.gmra.mxu1 %vm46_vm0, %v318_v38 }
 0x134   :  { %v363_v45 = vpop.f32.mrf.mxu0 }
 0x135   :  { %414 = vst.msk [vmem:[#allocation2] sm:$0xff] %vm413_vm10, %v363_v45 }
 0x138   :  { %v410_v46 = vpop.f32.mrf.mxu1 }
 0x139   :  { %415 = vst.msk [vmem:[#allocation2 + $0x8] sm:$0xff] %vm413_vm10, %v410_v46 }
 0x13a   :  { %428 = dma.vmem_to_hbm [thread:$0]  %s421_s1, 256, %s423_s19, [#allocation3], %s518_s20, %s518_s20, %s519_s21  }
 0x13b   :  { %515 = dma.done.wait [#allocation3], 256  }
 0x13c   :  { %516 = vsyncadd [#allocation3], 4294967040 }
 0x13d   :  { %433 = vsyncpa [#allocation3], 1 }

</bundles_post_ra>
